<compile_context>
chip_gen: v5e
topology: v5e:2x2
jax: 0.10.0
libtpu: 0.0.40
codegen_flags: <defaults>
</compile_context>

<pallas_src>
import jax
import jax.numpy as jnp
from jax.experimental import pallas as pl
from jax.experimental.pallas import tpu as pltpu

SUBLANE = 8  # sublane granularity for the batch (second-to-last) axis


def _round_up(n, m):
    return ((n + m - 1) // m) * m


def controller_kernel(x_ref, w1_ref, b1_ref, w2_ref, b2_ref, w3_ref, b3_ref,
                      out_ref):
    """Fused 3-layer MLP forward on one [tb, in_dim] batch tile.

    Matmuls run on the MXU with f32 accumulation; bias add + ReLU epilogue is
    done in f32 (v5e's VPU has no bf16 path).  Activations are cast back to
    the weight dtype before the next matmul so bf16 weights hit the bf16 MXU
    path on v6e/v7x.
    """
    x = x_ref[...]

    # Layer 1: Linear(in_dim, 64) + ReLU   (K=in_dim; Mosaic pads in-register)
    h1 = jnp.dot(x, w1_ref[...], preferred_element_type=jnp.float32)
    h1 = jnp.maximum(h1 + b1_ref[...], 0.0)

    # Layer 2: Linear(64, 64) + ReLU
    h2 = jnp.dot(h1.astype(w2_ref.dtype), w2_ref[...],
                 preferred_element_type=jnp.float32)
    h2 = jnp.maximum(h2 + b2_ref[...], 0.0)

    # Layer 3: Linear(64, action_dim) -> Q-values, stored at natural width
    q = jnp.dot(h2.astype(w3_ref.dtype), w3_ref[...],
                preferred_element_type=jnp.float32)
    out_ref[...] = (q + b3_ref[...]).astype(out_ref.dtype)


def prepare_params(params, compute_dtype=jnp.float32):
    """One-time parameter prep (hoisted out of the per-call hot path).

    Casts weights to the MXU compute dtype and keeps biases as f32 row
    vectors.  No HBM padding: weights are tiny and stay VMEM-resident.
    """
    prep = {}
    for k in ("w1", "w2", "w3"):
        prep[k] = params[k].astype(compute_dtype)
    for k in ("b1", "b2", "b3"):
        prep[k] = params[k].astype(jnp.float32).reshape(1, -1)
    return prep


def controller_forward(x, prepared, *, block_batch=4096, out_dtype=jnp.float32):
    """Run the fused Controller forward pass as a single pallas_call.

    x:           [batch, input_dim]; ideally already in the compute dtype
                 (f32 or bf16) so no extra cast/copy is emitted here.
    prepared:    output of prepare_params (weights [in, out], biases [1, out]).
    block_batch: max rows per grid step (multiple of 8 enforced).
    """
    w1, b1 = prepared["w1"], prepared["b1"]
    w2, b2 = prepared["w2"], prepared["b2"]
    w3, b3 = prepared["w3"], prepared["b3"]

    batch, in_dim = x.shape
    action_dim = w3.shape[1]

    if x.dtype != w1.dtype:
        x = x.astype(w1.dtype)  # caller should pass bf16 x for the bf16 path

    # Batch tile: multiple of the 8-row sublane granularity, capped at
    # block_batch.  When there are enough rows, cap at half so the grid has
    # >= 2 steps (lets "parallel" shard across v7x's two TensorCores; harmless
    # on single-TC v5e/v6e).
    bb = max(SUBLANE, (int(block_batch) // SUBLANE) * SUBLANE)
    rows = _round_up(max(batch, 1), SUBLANE)
    tb = min(rows, bb)
    if rows >= 2 * SUBLANE:
        tb = min(tb, max(SUBLANE, (rows // 2) // SUBLANE * SUBLANE))
    batch_p = _round_up(batch, tb)
    grid = (batch_p // tb,)

    xk = x
    if batch_p != batch:  # pad batch rows only when the tile doesn't divide it
        xk = jnp.zeros((batch_p, in_dim), x.dtype).at[:batch].set(x)

    resident = lambda a: pl.BlockSpec(a.shape, lambda i: (0,) * a.ndim)

    out = pl.pallas_call(
        controller_kernel,
        out_shape=jax.ShapeDtypeStruct((batch_p, action_dim), out_dtype),
        grid=grid,
        in_specs=[
            pl.BlockSpec((tb, in_dim), lambda i: (i, 0)),  # x: tiled over batch
            resident(w1), resident(b1),                    # weights/biases stay
            resident(w2), resident(b2),                    # resident in VMEM
            resident(w3), resident(b3),
        ],
        out_specs=pl.BlockSpec((tb, action_dim), lambda i: (i, 0)),
        compiler_params=pltpu.CompilerParams(
            dimension_semantics=("parallel",)),
    )(xk, w1, b1, w2, b2, w3, b3)

    return out if batch_p == batch else out[:batch]


def init_params(key, input_dim, action_dim, hidden=64):
    """Deterministic synthetic parameters (Kaiming-uniform-ish scaling)."""
    k1, k2, k3, k4, k5, k6 = jax.random.split(key, 6)

    def unif(k, shape, fan_in):
        bound = 1.0 / jnp.sqrt(jnp.float32(fan_in))
        return jax.random.uniform(k, shape, jnp.float32, -bound, bound)

    return {
        # stored as [in, out] (transpose of the PyTorch [out, in] convention)
        "w1": unif(k1, (input_dim, hidden), input_dim),
        "b1": unif(k2, (hidden,), input_dim),
        "w2": unif(k3, (hidden, hidden), hidden),
        "b2": unif(k4, (hidden,), hidden),
        "w3": unif(k5, (hidden, action_dim), hidden),
        "b3": unif(k6, (action_dim,), hidden),
    }


def reference_forward(x, params):
    """Plain-JAX reference for correctness checking."""
    h = jnp.maximum(x @ params["w1"] + params["b1"], 0.0)
    h = jnp.maximum(h @ params["w2"] + params["b2"], 0.0)
    return h @ params["w3"] + params["b3"]


if __name__ == "__main__":
    batch, input_dim, action_dim = 8, 32, 8

    key = jax.random.PRNGKey(0)
    kx, kp = jax.random.split(key)
    x = jax.random.normal(kx, (batch, input_dim), dtype=jnp.float32)
    params = init_params(kp, input_dim, action_dim)
    ref = reference_forward(x, params)

    # f32 path (single grid step at this batch)
    prep_f32 = prepare_params(params, jnp.float32)
    out = jax.block_until_ready(controller_forward(x, prep_f32))
    assert out.shape == (batch, action_dim)
    assert jnp.allclose(out, ref, atol=1e-5, rtol=1e-5)

    # bf16 activations/weights in HBM, f32 MXU accumulation (v6e/v7x fast path)
    prep_bf16 = prepare_params(params, jnp.bfloat16)
    out_bf16 = jax.block_until_ready(
        controller_forward(x.astype(jnp.bfloat16), prep_bf16))
    assert jnp.allclose(out_bf16, ref, atol=5e-2, rtol=5e-2)

    # Multi-tile grid path (exercises batch tiling + resident weights), grid=(3,)
    kx2, kx3 = jax.random.split(kx)
    x_big = jax.random.normal(kx2, (24, input_dim), dtype=jnp.float32)
    out_big = jax.block_until_ready(
        controller_forward(x_big, prep_f32, block_batch=8))
    assert out_big.shape == (24, action_dim)
    assert jnp.allclose(out_big, reference_forward(x_big, params),
                        atol=1e-4, rtol=1e-4)

    # Ragged batch (not a multiple of 8) -> exercises the row-padding fallback
    x_rag = jax.random.normal(kx3, (10, input_dim), dtype=jnp.float32)
    out_rag = jax.block_until_ready(
        controller_forward(x_rag, prep_f32, block_batch=8))
    assert out_rag.shape == (10, action_dim)
    assert jnp.allclose(out_rag, reference_forward(x_rag, params),
                        atol=1e-4, rtol=1e-4)

    print("KERNEL_OK")
</pallas_src>

<mosaic_0001>
module attributes {stable_mosaic.version = 11 : i64} {
  func.func @controller_kernel(%arg0: i32, %arg1: memref<8x32xf32, #tpu.memory_space<vmem>>, %arg2: memref<32x64xf32, #tpu.memory_space<vmem>>, %arg3: memref<1x64xf32, #tpu.memory_space<vmem>>, %arg4: memref<64x64xf32, #tpu.memory_space<vmem>>, %arg5: memref<1x64xf32, #tpu.memory_space<vmem>>, %arg6: memref<64x8xf32, #tpu.memory_space<vmem>>, %arg7: memref<1x8xf32, #tpu.memory_space<vmem>>, %arg8: memref<8x8xf32, #tpu.memory_space<vmem>>) attributes {dimension_semantics = [#tpu.dimension_semantics<parallel>], iteration_bounds = array<i64: 1>, scalar_prefetch = 0 : i64, scratch_operands = 0 : i64, tpu.core_type = #tpu.core_type<tc>, window_params = [{transform_indices = @transform_0, window_bounds = array<i64: 8, 32>}, {pipeline_mode = #tpu.pipeline_mode<synchronous>, transform_indices = @transform_1, window_bounds = array<i64: 32, 64>}, {pipeline_mode = #tpu.pipeline_mode<synchronous>, transform_indices = @transform_2, window_bounds = array<i64: 1, 64>}, {pipeline_mode = #tpu.pipeline_mode<synchronous>, transform_indices = @transform_3, window_bounds = array<i64: 64, 64>}, {pipeline_mode = #tpu.pipeline_mode<synchronous>, transform_indices = @transform_4, window_bounds = array<i64: 1, 64>}, {pipeline_mode = #tpu.pipeline_mode<synchronous>, transform_indices = @transform_5, window_bounds = array<i64: 64, 8>}, {pipeline_mode = #tpu.pipeline_mode<synchronous>, transform_indices = @transform_6, window_bounds = array<i64: 1, 8>}, {transform_indices = @transform_7, window_bounds = array<i64: 8, 8>}]} {
    %c0 = arith.constant 0 : index
    %c0_0 = arith.constant 0 : index
    %0 = vector.load %arg1[%c0, %c0_0] : memref<8x32xf32, #tpu.memory_space<vmem>>, vector<8x32xf32>
    %c0_1 = arith.constant 0 : index
    %c0_2 = arith.constant 0 : index
    %1 = vector.load %arg2[%c0_1, %c0_2] : memref<32x64xf32, #tpu.memory_space<vmem>>, vector<32x64xf32>
    %cst = arith.constant dense<0.000000e+00> : vector<8x64xf32>
    %2 = tpu.matmul %0, %1, %cst {dimension_numbers = #tpu.dot_dimension_numbers<[1], [0], [0], [1], [0, 0, 1, 1], [], []>} : vector<8x32xf32>, vector<32x64xf32>, vector<8x64xf32> -> vector<8x64xf32>
    %c0_3 = arith.constant 0 : index
    %c0_4 = arith.constant 0 : index
    %3 = vector.load %arg3[%c0_3, %c0_4] : memref<1x64xf32, #tpu.memory_space<vmem>>, vector<1x64xf32>
    %4 = vector.broadcast %3 : vector<1x64xf32> to vector<8x64xf32>
    %5 = arith.addf %2, %4 : vector<8x64xf32>
    %cst_5 = arith.constant 0.000000e+00 : f32
    %6 = vector.broadcast %cst_5 : f32 to vector<8x64xf32>
    %7 = arith.maximumf %5, %6 : vector<8x64xf32>
    %c0_6 = arith.constant 0 : index
    %c0_7 = arith.constant 0 : index
    %8 = vector.load %arg4[%c0_6, %c0_7] : memref<64x64xf32, #tpu.memory_space<vmem>>, vector<64x64xf32>
    %cst_8 = arith.constant dense<0.000000e+00> : vector<8x64xf32>
    %9 = tpu.matmul %7, %8, %cst_8 {dimension_numbers = #tpu.dot_dimension_numbers<[1], [0], [0], [1], [0, 0, 1, 1], [], []>} : vector<8x64xf32>, vector<64x64xf32>, vector<8x64xf32> -> vector<8x64xf32>
    %c0_9 = arith.constant 0 : index
    %c0_10 = arith.constant 0 : index
    %10 = vector.load %arg5[%c0_9, %c0_10] : memref<1x64xf32, #tpu.memory_space<vmem>>, vector<1x64xf32>
    %11 = vector.broadcast %10 : vector<1x64xf32> to vector<8x64xf32>
    %12 = arith.addf %9, %11 : vector<8x64xf32>
    %cst_11 = arith.constant 0.000000e+00 : f32
    %13 = vector.broadcast %cst_11 : f32 to vector<8x64xf32>
    %14 = arith.maximumf %12, %13 : vector<8x64xf32>
    %c0_12 = arith.constant 0 : index
    %c0_13 = arith.constant 0 : index
    %15 = vector.load %arg6[%c0_12, %c0_13] : memref<64x8xf32, #tpu.memory_space<vmem>>, vector<64x8xf32>
    %cst_14 = arith.constant dense<0.000000e+00> : vector<8x8xf32>
    %16 = tpu.matmul %14, %15, %cst_14 {dimension_numbers = #tpu.dot_dimension_numbers<[1], [0], [0], [1], [0, 0, 1, 1], [], []>} : vector<8x64xf32>, vector<64x8xf32>, vector<8x8xf32> -> vector<8x8xf32>
    %c0_15 = arith.constant 0 : index
    %c0_16 = arith.constant 0 : index
    %17 = vector.load %arg7[%c0_15, %c0_16] : memref<1x8xf32, #tpu.memory_space<vmem>>, vector<1x8xf32>
    %18 = vector.broadcast %17 : vector<1x8xf32> to vector<8x8xf32>
    %19 = arith.addf %16, %18 : vector<8x8xf32>
    %c0_17 = arith.constant 0 : index
    %c0_18 = arith.constant 0 : index
    %20 = vector.load %arg8[%c0_17, %c0_18] : memref<8x8xf32, #tpu.memory_space<vmem>>, vector<8x8xf32>
    tpu.vector_store %arg8[%c0_17, %c0_18], %19 {strides = array<i32>} : memref<8x8xf32, #tpu.memory_space<vmem>>, vector<8x8xf32>,
    return
  }
  func.func @transform_0(%arg0: i32) -> (i32, i32) {
    %c0_i32 = arith.constant 0 : i32
    %c0_i32_0 = arith.constant 0 : i32
    return %arg0, %c0_i32 : i32, i32
  }
  func.func @transform_1(%arg0: i32) -> (i32, i32) {
    %c0_i32 = arith.constant 0 : i32
    %c0_i32_0 = arith.constant 0 : i32
    %c0_i32_1 = arith.constant 0 : i32
    return %c0_i32, %c0_i32_0 : i32, i32
  }
  func.func @transform_2(%arg0: i32) -> (i32, i32) {
    %c0_i32 = arith.constant 0 : i32
    %c0_i32_0 = arith.constant 0 : i32
    %c0_i32_1 = arith.constant 0 : i32
    return %c0_i32, %c0_i32_0 : i32, i32
  }
  func.func @transform_3(%arg0: i32) -> (i32, i32) {
    %c0_i32 = arith.constant 0 : i32
    %c0_i32_0 = arith.constant 0 : i32
    %c0_i32_1 = arith.constant 0 : i32
    return %c0_i32, %c0_i32_0 : i32, i32
  }
  func.func @transform_4(%arg0: i32) -> (i32, i32) {
    %c0_i32 = arith.constant 0 : i32
    %c0_i32_0 = arith.constant 0 : i32
    %c0_i32_1 = arith.constant 0 : i32
    return %c0_i32, %c0_i32_0 : i32, i32
  }
  func.func @transform_5(%arg0: i32) -> (i32, i32) {
    %c0_i32 = arith.constant 0 : i32
    %c0_i32_0 = arith.constant 0 : i32
    %c0_i32_1 = arith.constant 0 : i32
    return %c0_i32, %c0_i32_0 : i32, i32
  }
  func.func @transform_6(%arg0: i32) -> (i32, i32) {
    %c0_i32 = arith.constant 0 : i32
    %c0_i32_0 = arith.constant 0 : i32
    %c0_i32_1 = arith.constant 0 : i32
    return %c0_i32, %c0_i32_0 : i32, i32
  }
  func.func @transform_7(%arg0: i32) -> (i32, i32) {
    %c0_i32 = arith.constant 0 : i32
    %c0_i32_0 = arith.constant 0 : i32
    return %arg0, %c0_i32 : i32, i32
  }
}

</mosaic_0001>

<bundles_post_ra>
// kernel: tpu_custom_call.1
= control target key start
LH: loop header
LB: loop body
LE: loop exit
PB: predicated region body
PF: predicated region fallthrough
CT: control target
= control target key end

     0   :  { %12 = vsyncpa [#allocation3], 0  ;;  %s340_s0 = inlined_call_operand.vmem [shape: f32[8,32], index: 0, kind: input, shape index: {}]   ;;  %s341_s1 = inlined_call_operand.hbm [shape: f32[32,64], index: 1, kind: input, shape index: {}]   ;;  %s342_s2 = inlined_call_operand.vmem [shape: f32[1,64], index: 2, kind: input, shape index: {}]   ;;  %s343_s3 = inlined_call_operand.vmem [shape: f32[64,64], index: 3, kind: input, shape index: {}]   ;;  %s344_s4 = inlined_call_operand.vmem [shape: f32[1,64], index: 4, kind: input, shape index: {}]   ;;  %s345_s5 = inlined_call_operand.vmem [shape: f32[64,8], index: 5, kind: input, shape index: {}]   ;;  %s346_s6 = inlined_call_operand.vmem [shape: f32[1,8], index: 6, kind: input, shape index: {}]   ;;  %s347_s7 = inlined_call_operand.hbm [shape: f32[8,8], index: 7, kind: output, shape index: {}]  }
   0x1   :  { %13 = vsyncpa [#allocation4], 0  ;;  %s20_s26 = sshll.u32 %s341_s1, 4  ;;  %s230_s27 = smov [#allocation2]   ;;  %s21_s26 = int_to_ptr.hbm [resolvable:$true] %s20_s26 }
   0x2   :  { %s22_s28 = sshll.u32 %s230_s27, 4  ;;  %s231_s29 = smov 128   ;;  %s23_s28 = int_to_ptr.vmem [resolvable:$true] %s22_s28 }
   0x3   :  { %s232_s30 = smov 8  }
   0x4   :  { %28 = dma.hbm_to_vmem [thread:$0]  %s21_s26, 512, %s23_s28, [#allocation3], %s231_s29, %s231_s29, %s232_s30  }
   0x5   :  { %226 = dma.done.wait [#allocation3], 512  }
   0x6   :  { %227 = vsyncadd [#allocation3], 4294966784  ;;  %v47_v0 = vld [vmem:[#allocation2 + $0x18] sm:$0xff]  ;;  %v46_v1 = vld [vmem:[#allocation2 + $0x10] sm:$0xff]  ;;  %vm52_vm0 = vcmask 261120   ;;  %vm89_vm1 = vcmask 523264  }
   0x7   :  { %68 = vmatpush.msra.mxu0 %v47_v0  ;;  %v84_v2 = vld [vmem:[%s343_s3 + $0x38] sm:$0xff]  ;;  %v45_v3 = vld [vmem:[#allocation2 + $0x8] sm:$0xff]  ;;  %v83_v4 = vld [vmem:[%s343_s3 + $0x30] sm:$0xff]  ;;  %s233_s20 = smov [#allocation5]   ;;  %s158_s23 = sshll.u32 %s347_s7, 4  ;;  %vm149_vm2 = vcmask 64512   ;;  %s159_s23 = int_to_ptr.hbm [resolvable:$true] %s158_s23 }
   0x8   :  { %101 = vmatpush.msra.mxu1 %v84_v2  ;;  %v82_v5 = vld [vmem:[%s343_s3 + $0x28] sm:$0xff]  ;;  %v44_v6 = vld [vmem:[#allocation2] sm:$0xff]  ;;  %v80_v9 = vld [vmem:[%s343_s3 + $0x18] sm:$0xff] }
   0x9   :  { %69 = vmatpush.msra.mxu0 %v46_v1  ;;  %v43_v7 = vld [vmem:[%s340_s0] sm:$0xff]  ;;  %v79_v10 = vld [vmem:[%s343_s3 + $0x10] sm:$0xff]  ;;  %v78_v11 = vld [vmem:[%s343_s3 + $0x8] sm:$0xff]  ;;  %s156_s0 = sshll.u32 %s233_s20, 4  ;;  %s157_s0 = int_to_ptr.vmem [resolvable:$true] %s156_s0 }
   0xa   :  { %102 = vmatpush.msra.mxu1 %v83_v4  ;;  %v81_v8 = vld [vmem:[%s343_s3 + $0x20] sm:$0xff]  ;;  %v121_v13 = vld [vmem:[%s345_s5 + $0x38] sm:$0xff]  ;;  %v120_v14 = vld [vmem:[%s345_s5 + $0x30] sm:$0xff] }
   0xb   :  { %70 = vmatpush.msra.mxu0 %v45_v3  ;;  %v77_v12 = vld [vmem:[%s343_s3] sm:$0xff]  ;;  %137 = vmatpush.msra.mxu2 %v121_v13  ;;  %v119_v15 = vld [vmem:[%s345_s5 + $0x28] sm:$0xff]  ;;  %v117_v17 = vld [vmem:[%s345_s5 + $0x18] sm:$0xff] }
   0xc   :  { %103 = vmatpush.msra.mxu1 %v82_v5  ;;  %v118_v16 = vld [vmem:[%s345_s5 + $0x20] sm:$0xff]  ;;  %v116_v22 = vld [vmem:[%s345_s5 + $0x10] sm:$0xff]  ;;  %v115_v23 = vld [vmem:[%s345_s5 + $0x8] sm:$0xff] }
   0xd   :  { %71 = vmatpush.msra.mxu0 %v44_v6  ;;  %138 = vmatpush.msra.mxu2 %v120_v14  ;;  %v175_v18 = vld [vmem:[%s342_s2] ss:$0 sm:$0xff] }
   0xe   :  { %168 = vmatmul.msk.f32.vlgmr.msra.gmra.mxu0 %vm52_vm0, %v43_v7  ;;  %104 = vmatpush.msra.mxu1 %v81_v8  ;;  %v114_v24 = vld [vmem:[%s345_s5] sm:$0xff] }
   0xf   :  { %139 = vmatpush.msra.mxu2 %v119_v15  ;;  %v176_v25 = vld [vmem:[%s344_s4] ss:$0 sm:$0xff] }
  0x10   :  { %105 = vmatpush.msra.mxu1 %v80_v9  ;;  %v177_v29 = vld [vmem:[%s346_s6] ss:$0 sm:$0xff] }
  0x11   :  { %140 = vmatpush.msra.mxu2 %v118_v16 }
  0x12   :  { %106 = vmatpush.msra.mxu1 %v79_v10 }
  0x13   :  { %141 = vmatpush.msra.mxu2 %v117_v17 }
  0x14   :  { %107 = vmatpush.msra.mxu1 %v78_v11 }
  0x15   :  { %142 = vmatpush.msra.mxu2 %v116_v22 }
  0x16   :  { %108 = vmatpush.msra.mxu1 %v77_v12 }
  0x17   :  { %143 = vmatpush.msra.mxu2 %v115_v23 }
  0x19   :  { %144 = vmatpush.msra.mxu2 %v114_v24 }
  0x8b   :  { %v73_v19 = vpop.f32.mrf.mxu0 }
  0x8c   :  { %v74_v20 = vadd.f32 %v175_v18, %v73_v19 }
  0x8e   :  { %v76_v21 = vmax.f32 %v74_v20, 0.0 }
  0x90   :  { %169 = vmatmul.msk.f32.vlgmr.msra.gmra.mxu1 %vm89_vm1, %v76_v21 }
 0x10d   :  { %v110_v26 = vpop.f32.mrf.mxu1 }
 0x10e   :  { %v111_v27 = vadd.f32 %v176_v25, %v110_v26 }
 0x110   :  { %v113_v28 = vmax.f32 %v111_v27, 0.0 }
 0x112   :  { %170 = vmatmul.msk.f32.vlgmr.msra.gmra.mxu2 %vm89_vm1, %v113_v28 }
 0x195   :  { %v146_v30 = vpop.f32.mrf.mxu2 }
 0x196   :  { %v147_v31 = vadd.f32 %v177_v29, %v146_v30 }
 0x198   :  { %150 = vst.msk [vmem:[#allocation5] sm:$0xff] %vm149_vm2, %v147_v31 }
 0x199   :  { %161 = dma.vmem_to_hbm [thread:$0]  %s157_s0, 128, %s159_s23, [#allocation4]  }
 0x19a   :  { %228 = dma.done.wait [#allocation4], 128  }
 0x19b   :  { %229 = vsyncadd [#allocation4], 4294967168 }
 0x19c   :  { %166 = vsyncpa [#allocation3], 1 }
 0x19d   :  { %167 = vsyncpa [#allocation4], 1 }

</bundles_post_ra>
